<compile_context>
chip_gen: v7x
topology: tpu7x:2x2x1
jax: 0.10.0
libtpu: 0.0.40
codegen_flags: <defaults>
</compile_context>

<pallas_src>
import jax
import jax.numpy as jnp
from jax.experimental import pallas as pl
from jax.experimental.pallas import tpu as pltpu


def _round_up(x, m):
    return ((x + m - 1) // m) * m


def build_normalized_adjacency(edge_index, num_nodes):
    """Dense D^-1/2 A D^-1/2 exactly as PyG's gcn_norm (add_self_loops=False).

    edge_index: int32 [2, E], row 0 = source, row 1 = target.
    Aggregation writes into the target node: out[dst] += norm * x[src].
    """
    src = edge_index[0]
    dst = edge_index[1]
    ones = jnp.ones(src.shape[0], dtype=jnp.float32)
    deg = jnp.zeros((num_nodes,), jnp.float32).at[dst].add(ones)
    deg_inv_sqrt = jnp.where(deg > 0, 1.0 / jnp.sqrt(deg), 0.0)
    norm = deg_inv_sqrt[src] * deg_inv_sqrt[dst]
    adj = jnp.zeros((num_nodes, num_nodes), jnp.float32)
    adj = adj.at[dst, src].add(norm)
    return adj


def fused_gcn_kernel(adj_ref, x_ref, w_ref, b_ref, o_ref, xbuf, hbuf, acc):
    """One grid step of the fused L-layer GCN.  grid = (L, row_tiles, k_tiles).

      adj_ref : (tm, tk)          bf16  A_hat tile [row block i, col block k]
      x_ref   : (N_pad, H_pad)    bf16  initial node features (resident, DMA'd once)
      w_ref   : (1, H_pad, H_pad) bf16  W[l]
      b_ref   : (1, 1, H_pad)     f32   b[l]
      o_ref   : (tm, H_pad)       f32   output row tile (last layer's values survive)
      xbuf    : (N_pad, H_pad)    bf16  current layer's input x   (VMEM scratch)
      hbuf    : (N_pad, H_pad)    bf16  h = x @ W[l]              (VMEM scratch)
      acc     : (tm, H_pad)       f32   accumulator for A_hat @ h (VMEM scratch)
    """
    l = pl.program_id(0)
    i = pl.program_id(1)
    k = pl.program_id(2)
    nk = pl.num_programs(2)
    tm, tk = adj_ref.shape

    # Load the initial node features into the resident scratch exactly once.
    @pl.when((l == 0) & (i == 0) & (k == 0))
    def _():
        xbuf[...] = x_ref[...]

    # Once per layer: h = x @ W[l] (the small 2*N*H^2 matmul), kept resident so
    # the big A_hat @ h matmul never recomputes it per output tile.
    @pl.when((i == 0) & (k == 0))
    def _():
        hbuf[...] = jnp.dot(
            xbuf[...], w_ref[0], preferred_element_type=jnp.float32
        ).astype(hbuf.dtype)

    # Accumulator init at the start of every reduction.
    @pl.when(k == 0)
    def _():
        acc[...] = jnp.zeros_like(acc)

    # acc += A_hat[i, k] @ h[k]   (MXU: bf16 inputs, f32 accumulate)
    koff = pl.multiple_of(k * tk, tk)
    acc[...] += jnp.dot(
        adj_ref[...], hbuf[pl.ds(koff, tk), :], preferred_element_type=jnp.float32
    )

    # Finalize row tile: add bias once, emit output tile, and write this row
    # tile of the next layer's input.
    @pl.when(k == nk - 1)
    def _():
        res = acc[...] + b_ref[0]
        o_ref[...] = res.astype(o_ref.dtype)
        roff = pl.multiple_of(i * tm, tm)
        xbuf[pl.ds(roff, tm), :] = res.astype(xbuf.dtype)


def graph_encoder_forward(x, edge_index, weights, biases, *, tile=256):
    """Fused forward: x <- A_hat @ (x @ W_l) + b_l for l = 0..L-1, one pallas_call.

    weights: [L, H, H] f32, biases: [L, 1, H] f32.
    """
    N, H = x.shape
    L = weights.shape[0]

    # Lane-dense hidden dim; tiles respect the (8, 128) layout constraint.
    H_pad = _round_up(H, 128)
    tm = tk = min(tile, _round_up(N, 128))
    N_pad = _round_up(N, tm)

    adj = build_normalized_adjacency(edge_index, N)  # plain-JAX glue

    # bf16 matmul operands (native MXU dtype); zero padding keeps results exact.
    adj_p = jnp.zeros((N_pad, N_pad), jnp.bfloat16).at[:N, :N].set(
        adj.astype(jnp.bfloat16))
    x_p = jnp.zeros((N_pad, H_pad), jnp.bfloat16).at[:N, :H].set(
        x.astype(jnp.bfloat16))
    w_p = jnp.zeros((L, H_pad, H_pad), jnp.bfloat16).at[:, :H, :H].set(
        weights.astype(jnp.bfloat16))
    b_p = jnp.zeros((L, 1, H_pad), jnp.float32).at[:, :, :H].set(biases)

    grid = (L, N_pad // tm, N_pad // tk)

    # Explicit VMEM budget: double-buffered ins/outs + resident scratch + headroom.
    vmem_bytes = (
        2 * tm * tk * 2            # adj tiles (bf16)
        + 2 * N_pad * H_pad * 2    # x input (bf16)
        + 2 * H_pad * H_pad * 2    # W[l] (bf16)
        + 2 * H_pad * 4            # b[l]
        + 2 * tm * H_pad * 4       # out tile (f32)
        + 2 * N_pad * H_pad * 2    # xbuf + hbuf scratch (bf16)
        + tm * H_pad * 4           # acc scratch (f32)
    )
    vmem_limit = min(max(int(vmem_bytes * 1.5) + (4 << 20), 16 * 1024 * 1024),
                     48 * 1024 * 1024)

    out = pl.pallas_call(
        fused_gcn_kernel,
        out_shape=jax.ShapeDtypeStruct((N_pad, H_pad), jnp.float32),
        grid_spec=pltpu.PrefetchScalarGridSpec(
            num_scalar_prefetch=0,
            grid=grid,
            in_specs=[
                pl.BlockSpec((tm, tk), lambda l, i, k: (i, k)),              # A_hat
                pl.BlockSpec((N_pad, H_pad), lambda l, i, k: (0, 0)),        # x (resident)
                pl.BlockSpec((1, H_pad, H_pad), lambda l, i, k: (l, 0, 0)),  # W[l]
                pl.BlockSpec((1, 1, H_pad), lambda l, i, k: (l, 0, 0)),      # b[l]
            ],
            out_specs=pl.BlockSpec((tm, H_pad), lambda l, i, k: (i, 0)),
            scratch_shapes=[
                pltpu.VMEM((N_pad, H_pad), jnp.bfloat16),  # xbuf
                pltpu.VMEM((N_pad, H_pad), jnp.bfloat16),  # hbuf
                pltpu.VMEM((tm, H_pad), jnp.float32),      # acc
            ],
        ),
        compiler_params=pltpu.CompilerParams(
            # The row-tile axis stays "arbitrary": the fused layer loop carries x
            # between layers through a shared VMEM scratch, which a megacore shard
            # would break.
            # TODO(synk): per-layer calls with a "parallel" row axis would engage
            # v7x's 2nd TensorCore at the cost of reloading A_hat every layer.
            dimension_semantics=("arbitrary", "arbitrary", "arbitrary"),
            vmem_limit_bytes=vmem_limit,
        ),
    )(adj_p, x_p, w_p, b_p)

    return out[:N, :H]


class GraphEncoderPallas:
    """Pallas port of GraphEncoder: a stack of GCNConv(hidden, hidden) layers."""

    def __init__(self, layers, hidden_dim, dropout, key):
        self.layers = layers
        self.hidden_dim = hidden_dim
        self.dropout = dropout  # declared but never applied in the reference forward
        limit = (6.0 / (hidden_dim + hidden_dim)) ** 0.5  # glorot-uniform like PyG
        ws, bs = [], []
        for i in range(layers):
            k = jax.random.fold_in(key, i)
            ws.append(jax.random.uniform(k, (hidden_dim, hidden_dim), jnp.float32,
                                         minval=-limit, maxval=limit))
            bs.append(jnp.zeros((1, hidden_dim), jnp.float32))  # PyG bias init = zeros
        self.weights = jnp.stack(ws)  # [L, H, H]
        self.biases = jnp.stack(bs)   # [L, 1, H]

    def __call__(self, x, edge_index):
        return graph_encoder_forward(x, edge_index, self.weights, self.biases)


def reference_forward(weights, biases, x, edge_index):
    """Pure-JAX reference that mirrors the kernel's bf16 matmul / f32 accumulate."""
    adj = build_normalized_adjacency(edge_index, x.shape[0]).astype(jnp.bfloat16)
    h = x.astype(jnp.bfloat16)
    out = None
    for l in range(weights.shape[0]):
        t = jnp.dot(h, weights[l].astype(jnp.bfloat16),
                    preferred_element_type=jnp.float32).astype(jnp.bfloat16)
        out = jnp.dot(adj, t, preferred_element_type=jnp.float32) + biases[l]
        h = out.astype(jnp.bfloat16)
    return out


if __name__ == "__main__":
    root = jax.random.PRNGKey(0)

    def run_case(num_nodes, hidden_dim, num_layers, num_edges, case_key):
        k_x, k_e, k_p = jax.random.split(case_key, 3)
        x = jax.random.normal(k_x, (num_nodes, hidden_dim), jnp.float32)
        edge_index = jax.random.randint(k_e, (2, num_edges), 0, num_nodes, jnp.int32)
        model = GraphEncoderPallas(num_layers, hidden_dim, dropout=0.1, key=k_p)
        out = jax.block_until_ready(model(x, edge_index))
        ref = reference_forward(model.weights, model.biases, x, edge_index)
        assert out.shape == (num_nodes, hidden_dim)
        assert jnp.allclose(out, ref, atol=1e-2, rtol=1e-2), "mismatch vs reference"
        return out

    # Small case matching the module's natural scale.
    run_case(num_nodes=16, hidden_dim=32, num_layers=2, num_edges=40,
             case_key=jax.random.fold_in(root, 0))
    # Slightly larger case that exercises multiple row/k tiles and 3 fused layers.
    run_case(num_nodes=300, hidden_dim=32, num_layers=3, num_edges=1200,
             case_key=jax.random.fold_in(root, 1))

    print("KERNEL_OK")
</pallas_src>

<mosaic_0001>
module attributes {stable_mosaic.version = 11 : i64} {
  func.func @fused_gcn_kernel(%arg0: i32, %arg1: i32, %arg2: i32, %arg3: memref<128x128xbf16, #tpu.memory_space<vmem>>, %arg4: memref<128x128xbf16, #tpu.memory_space<vmem>>, %arg5: memref<1x128x128xbf16, #tpu.memory_space<vmem>>, %arg6: memref<1x1x128xf32, #tpu.memory_space<vmem>>, %arg7: memref<128x128xf32, #tpu.memory_space<vmem>>, %arg8: memref<128x128xbf16, #tpu.memory_space<vmem>>, %arg9: memref<128x128xbf16, #tpu.memory_space<vmem>>, %arg10: memref<128x128xf32, #tpu.memory_space<vmem>>) attributes {dimension_semantics = [#tpu.dimension_semantics<arbitrary>, #tpu.dimension_semantics<arbitrary>, #tpu.dimension_semantics<arbitrary>], iteration_bounds = array<i64: 2, 1, 1>, scalar_prefetch = 0 : i64, scratch_operands = 3 : i64, tpu.core_type = #tpu.core_type<tc>, window_params = [{transform_indices = @transform_0, window_bounds = array<i64: 128, 128>}, {pipeline_mode = #tpu.pipeline_mode<synchronous>, transform_indices = @transform_1, window_bounds = array<i64: 128, 128>}, {transform_indices = @transform_2, window_bounds = array<i64: 1, 128, 128>}, {transform_indices = @transform_3, window_bounds = array<i64: 1, 1, 128>}, {transform_indices = @transform_4, window_bounds = array<i64: 128, 128>}]} {
    %c0_i32 = arith.constant 0 : i32
    %0 = arith.cmpi eq, %arg0, %c0_i32 : i32
    %c0_i32_0 = arith.constant 0 : i32
    %1 = arith.cmpi eq, %arg1, %c0_i32_0 : i32
    %2 = arith.andi %0, %1 : i1
    %c0_i32_1 = arith.constant 0 : i32
    %3 = arith.cmpi eq, %arg2, %c0_i32_1 : i32
    %4 = arith.andi %2, %3 : i1
    %5 = arith.extui %4 : i1 to i32
    %c0_i32_2 = arith.constant 0 : i32
    %6 = arith.cmpi ne, %5, %c0_i32_2 : i32
    scf.if %6 {
      %c0_16 = arith.constant 0 : index
      %c0_17 = arith.constant 0 : index
      %27 = vector.load %arg4[%c0_16, %c0_17] : memref<128x128xbf16, #tpu.memory_space<vmem>>, vector<128x128xbf16>
      %c0_18 = arith.constant 0 : index
      %c0_19 = arith.constant 0 : index
      %28 = vector.load %arg8[%c0_18, %c0_19] : memref<128x128xbf16, #tpu.memory_space<vmem>>, vector<128x128xbf16>
      tpu.vector_store %arg8[%c0_18, %c0_19], %27 {strides = array<i32>} : memref<128x128xbf16, #tpu.memory_space<vmem>>, vector<128x128xbf16>,
    } else {
    }
    %c0_i32_3 = arith.constant 0 : i32
    %7 = arith.cmpi eq, %arg1, %c0_i32_3 : i32
    %c0_i32_4 = arith.constant 0 : i32
    %8 = arith.cmpi eq, %arg2, %c0_i32_4 : i32
    %9 = arith.andi %7, %8 : i1
    %10 = arith.extui %9 : i1 to i32
    %c0_i32_5 = arith.constant 0 : i32
    %11 = arith.cmpi ne, %10, %c0_i32_5 : i32
    scf.if %11 {
      %c0_16 = arith.constant 0 : index
      %c0_17 = arith.constant 0 : index
      %27 = vector.load %arg8[%c0_16, %c0_17] : memref<128x128xbf16, #tpu.memory_space<vmem>>, vector<128x128xbf16>
      %c0_18 = arith.constant 0 : index
      %c0_19 = arith.constant 0 : index
      %c0_20 = arith.constant 0 : index
      %28 = vector.load %arg5[%c0_18, %c0_19, %c0_20] : memref<1x128x128xbf16, #tpu.memory_space<vmem>>, vector<1x128x128xbf16>
      %29 = vector.shape_cast %28 : vector<1x128x128xbf16> to vector<128x128xbf16>
      %cst_21 = arith.constant dense<0.000000e+00> : vector<128x128xf32>
      %30 = tpu.matmul %27, %29, %cst_21 {dimension_numbers = #tpu.dot_dimension_numbers<[1], [0], [0], [1], [0, 0, 1, 1], [], []>} : vector<128x128xbf16>, vector<128x128xbf16>, vector<128x128xf32> -> vector<128x128xf32>
      %31 = arith.truncf %30 : vector<128x128xf32> to vector<128x128xbf16>
      %c0_22 = arith.constant 0 : index
      %c0_23 = arith.constant 0 : index
      %32 = vector.load %arg9[%c0_22, %c0_23] : memref<128x128xbf16, #tpu.memory_space<vmem>>, vector<128x128xbf16>
      tpu.vector_store %arg9[%c0_22, %c0_23], %31 {strides = array<i32>} : memref<128x128xbf16, #tpu.memory_space<vmem>>, vector<128x128xbf16>,
    } else {
    }
    %c0_i32_6 = arith.constant 0 : i32
    %12 = arith.cmpi eq, %arg2, %c0_i32_6 : i32
    %13 = arith.extui %12 : i1 to i32
    %c0_i32_7 = arith.constant 0 : i32
    %14 = arith.cmpi ne, %13, %c0_i32_7 : i32
    scf.if %14 {
      %cst_16 = arith.constant 0.000000e+00 : f32
      %27 = vector.broadcast %cst_16 : f32 to vector<128x128xf32>
      %c0_17 = arith.constant 0 : index
      %c0_18 = arith.constant 0 : index
      %28 = vector.load %arg10[%c0_17, %c0_18] : memref<128x128xf32, #tpu.memory_space<vmem>>, vector<128x128xf32>
      tpu.vector_store %arg10[%c0_17, %c0_18], %27 {strides = array<i32>} : memref<128x128xf32, #tpu.memory_space<vmem>>, vector<128x128xf32>,
    } else {
    }
    %c128_i32 = arith.constant 128 : i32
    %15 = arith.muli %arg2, %c128_i32 : i32
    %16 = tpu.assume_multiple %15, 128 : i32
    %c0 = arith.constant 0 : index
    %c0_8 = arith.constant 0 : index
    %17 = vector.load %arg10[%c0, %c0_8] : memref<128x128xf32, #tpu.memory_space<vmem>>, vector<128x128xf32>
    %c0_9 = arith.constant 0 : index
    %c0_10 = arith.constant 0 : index
    %18 = vector.load %arg3[%c0_9, %c0_10] : memref<128x128xbf16, #tpu.memory_space<vmem>>, vector<128x128xbf16>
    %19 = arith.index_cast %16 : i32 to index
    %c0_11 = arith.constant 0 : index
    %20 = vector.load %arg9[%19, %c0_11] : memref<128x128xbf16, #tpu.memory_space<vmem>>, vector<128x128xbf16>
    %cst = arith.constant dense<0.000000e+00> : vector<128x128xf32>
    %21 = tpu.matmul %18, %20, %cst {dimension_numbers = #tpu.dot_dimension_numbers<[1], [0], [0], [1], [0, 0, 1, 1], [], []>} : vector<128x128xbf16>, vector<128x128xbf16>, vector<128x128xf32> -> vector<128x128xf32>
    %22 = arith.addf %17, %21 : vector<128x128xf32>
    %c0_12 = arith.constant 0 : index
    %c0_13 = arith.constant 0 : index
    %23 = vector.load %arg10[%c0_12, %c0_13] : memref<128x128xf32, #tpu.memory_space<vmem>>, vector<128x128xf32>
    tpu.vector_store %arg10[%c0_12, %c0_13], %22 {strides = array<i32>} : memref<128x128xf32, #tpu.memory_space<vmem>>, vector<128x128xf32>,
    %c0_i32_14 = arith.constant 0 : i32
    %24 = arith.cmpi eq, %arg2, %c0_i32_14 : i32
    %25 = arith.extui %24 : i1 to i32
    %c0_i32_15 = arith.constant 0 : i32
    %26 = arith.cmpi ne, %25, %c0_i32_15 : i32
    scf.if %26 {
      %c0_16 = arith.constant 0 : index
      %c0_17 = arith.constant 0 : index
      %27 = vector.load %arg10[%c0_16, %c0_17] : memref<128x128xf32, #tpu.memory_space<vmem>>, vector<128x128xf32>
      %c0_18 = arith.constant 0 : index
      %c0_19 = arith.constant 0 : index
      %c0_20 = arith.constant 0 : index
      %28 = vector.load %arg6[%c0_18, %c0_19, %c0_20] : memref<1x1x128xf32, #tpu.memory_space<vmem>>, vector<1x1x128xf32>
      %29 = vector.shape_cast %28 : vector<1x1x128xf32> to vector<1x128xf32>
      %30 = vector.broadcast %29 : vector<1x128xf32> to vector<128x128xf32>
      %31 = arith.addf %27, %30 : vector<128x128xf32>
      %c0_21 = arith.constant 0 : index
      %c0_22 = arith.constant 0 : index
      %32 = vector.load %arg7[%c0_21, %c0_22] : memref<128x128xf32, #tpu.memory_space<vmem>>, vector<128x128xf32>
      tpu.vector_store %arg7[%c0_21, %c0_22], %31 {strides = array<i32>} : memref<128x128xf32, #tpu.memory_space<vmem>>, vector<128x128xf32>,
      %c128_i32_23 = arith.constant 128 : i32
      %33 = arith.muli %arg1, %c128_i32_23 : i32
      %34 = tpu.assume_multiple %33, 128 : i32
      %35 = arith.truncf %31 : vector<128x128xf32> to vector<128x128xbf16>
      %36 = arith.index_cast %34 : i32 to index
      %c0_24 = arith.constant 0 : index
      %37 = vector.load %arg8[%36, %c0_24] : memref<128x128xbf16, #tpu.memory_space<vmem>>, vector<128x128xbf16>
      tpu.vector_store %arg8[%36, %c0_24], %35 {strides = array<i32>} : memref<128x128xbf16, #tpu.memory_space<vmem>>, vector<128x128xbf16>,
    } else {
    }
    return
  }
  func.func @transform_0(%arg0: i32, %arg1: i32, %arg2: i32) -> (i32, i32) {
    %c0_i32 = arith.constant 0 : i32
    return %arg1, %arg2 : i32, i32
  }
  func.func @transform_1(%arg0: i32, %arg1: i32, %arg2: i32) -> (i32, i32) {
    %c0_i32 = arith.constant 0 : i32
    %c0_i32_0 = arith.constant 0 : i32
    %c0_i32_1 = arith.constant 0 : i32
    return %c0_i32, %c0_i32_0 : i32, i32
  }
  func.func @transform_2(%arg0: i32, %arg1: i32, %arg2: i32) -> (i32, i32, i32) {
    %c0_i32 = arith.constant 0 : i32
    %c0_i32_0 = arith.constant 0 : i32
    %c0_i32_1 = arith.constant 0 : i32
    return %arg0, %c0_i32, %c0_i32_0 : i32, i32, i32
  }
  func.func @transform_3(%arg0: i32, %arg1: i32, %arg2: i32) -> (i32, i32, i32) {
    %c0_i32 = arith.constant 0 : i32
    %c0_i32_0 = arith.constant 0 : i32
    %c0_i32_1 = arith.constant 0 : i32
    return %arg0, %c0_i32, %c0_i32_0 : i32, i32, i32
  }
  func.func @transform_4(%arg0: i32, %arg1: i32, %arg2: i32) -> (i32, i32) {
    %c0_i32 = arith.constant 0 : i32
    %c0_i32_0 = arith.constant 0 : i32
    return %arg1, %c0_i32 : i32, i32
  }
}

</mosaic_0001>

<bundles_post_ra>
// kernel: tpu_custom_call.1
= control target key start
LH: loop header
LB: loop body
LE: loop exit
PB: predicated region body
PF: predicated region fallthrough
CT: control target
= control target key end

     0   :  { %9 = vsyncpa [#allocation6], 0  ;;  %s1694_s0 = inlined_call_operand.hbm [shape: bf16[128,128], index: 0, kind: input, shape index: {}]   ;;  %s1695_s1 = inlined_call_operand.hbm [shape: bf16[128,128], index: 1, kind: input, shape index: {}]   ;;  %s1696_s2 = inlined_call_operand.hbm [shape: bf16[2,128,128], index: 2, kind: input, shape index: {}]   ;;  %s1697_s3 = inlined_call_operand.vmem [shape: f32[2,1,128], index: 3, kind: input, shape index: {}]   ;;  %s1698_s4 = inlined_call_operand.hbm [shape: f32[128,128], index: 4, kind: output, shape index: {}]  }
   0x1   :  { %10 = vsyncpa [#allocation9], 0 }
   0x2   :  { %11 = vsyncpa [#allocation7], 0  ;;  %s1447_s15 = smov 0   ;;  %s1449_s16 = smov 0  }
   0x3   :  { %s1451_s17 = smov 0   ;;  %s1453_s18 = smov 0  }
   0x4   :  { %s1455_s19 = smov 0   ;;  %s1457_s20 = smov 0  }
   0x5 LB: > { %s1476_s21 = sadd.s32 4294967295, %s1412_s20   ;;  %p99_p0 = scmp.ne.s32.totalorder %s1400_s17, %s1396_s16  ;;  %s1412_s20 = sphi %s1457_s20, %s17_s20   ;;  %s1408_s19 = sphi %s1455_s19, %s1718_s19   ;;  %s1404_s18 = sphi %s1453_s18, %s1717_s18   ;;  %s1400_s17 = sphi %s1451_s17, %s1716_s17   ;;  %s1396_s16 = sphi %s1449_s16, %s1715_s16   ;;  %s1392_s15 = sphi %s1447_s15, %s1714_s15  }
   0x6   : > { %p100_p1 = scmp.eq.s32.totalorder %s1412_s20, 0  ;;  %p105_p2 = scmp.ne.s32.totalorder %s1396_s16, %s1392_s15 }
   0x7   : > { %p1699_p3 = scmp.eq.s32.totalorder %s1476_s21, 0  ;;  %p986_p4 = scmp.ge.s32.totalorder %s1412_s20, 1 }
   0x8   : > { %p101_p5 = por %p100_p1, %p99_p0  ;;  %p168_p6 = scmp.lt.s32.totalorder %s1412_s20, 3 }
   0x9   : > { %p1487_p7 = por %p1699_p3, %p105_p2  ;;  %s1414_s24 = smov [#allocation5]  }
   0xa   : > { %p1491_p8 = pnand %p986_p4, %p168_p6  ;;  %s184_s25 = sshll.u32 %s1414_s24, 4  ;;  %s185_s25 = int_to_ptr.vmem [resolvable:$true] %s184_s25 }
   0xb   : > { %s1703_s22 = scalar_select %p1487_p7, 1, 0 }
   0xc   : > { %s1704_s23 = scalar_select %p1491_p8, 1, 0 }
   0xd   : > { %p1141_p9 = pneg %p1491_p8  ;;  %p1154_p11 = scmp.lt.s32.totalorder %s1412_s20, 2 }
   0xe   : > { %s1238_s30 = scalar_lea.hbm %s1694_s0, 1024 }
   0xf   : > { %p1499_p10 = pnand %p1141_p9, %p1699_p3  ;;  %p1504_p12 = pnand %p1154_p11, %p101_p5 }
  0x10   : > { %p1239_p13 = scmp.ne.s32.totalorder %s1694_s0, %s1238_s30  ;;  %p1245_p4 = scmp.lt.u32.totalorder %s1238_s30, %s1694_s0 }
  0x11   : > { %s1706_s27 = scalar_select %p1504_p12, 1, 0 }
  0x12   : > { %p1240_p0 = pneg %p1499_p10 }
  0x14   : > { %p1241_p1 = pnand %p1240_p0, %p1239_p13 }
  0x16   : > { %p1242_p2 = pneg %p1241_p1 }
  0x18   : > { %p1247_p5 = pnand %p1245_p4, %p1242_p2 }
  0x1a   : > { %1250 = shalt.err (!%p1247_p5)
}
  0x1b   : > { %s1251_s9 = scalar_lea.vmem %s185_s25, 1024  ;;  %p1259_p3 = scmp.lt.s32.totalorder %s185_s25, %s185_s25 }
  0x1c   : > { %p1252_p6 = scmp.ne.s32.totalorder %s185_s25, %s1251_s9  ;;  %p1260_p7 = scmp.lt.s32.totalorder %s1251_s9, %s1251_s9 }
  0x1e   : > { %p1254_p9 = pnand %p1252_p6, %p1240_p0  ;;  %p1261_p8 = por %p1260_p7, %p1259_p3 }
  0x20   : > { %p1255_p11 = pneg %p1254_p9 }
  0x22   : > { %p1262_p12 = pnand %p1261_p8, %p1255_p11 }
  0x24   : > { %1265 = shalt.err (!%p1262_p12)
}
  0x25   : > { %s1415_s10 = smov 64   ;;  %s1416_s11 = smov 4  }
  0x26   : > { %1144 = dma.hbm_to_vmem [thread:$0]  (!%p1499_p10), %s1694_s0, 1024, %s185_s25, [#allocation6], %s1415_s10, %s1415_s10, %s1416_s11  }
  0x27   : > { %s1417_s14 = smov [#allocation8]   ;;  %s1266_s29 = scalar_lea.hbm %s1695_s1, 1024 }
  0x28   : > { %s197_s15 = sshll.u32 %s1417_s14, 4  ;;  %p1267_p3 = scmp.ne.s32.totalorder %s1695_s1, %s1266_s29  ;;  %s198_s15 = int_to_ptr.vmem [resolvable:$true] %s197_s15 }
  0x29   : > { %p1273_p12 = scmp.lt.u32.totalorder %s1266_s29, %s1695_s1 }
  0x2a   : > { %p1269_p7 = pnand %p1267_p3, %p1240_p0 }
  0x2c   : > { %p1270_p8 = pneg %p1269_p7 }
  0x2e   : > { %p1275_p13 = pnand %p1273_p12, %p1270_p8 }
  0x30   : > { %1278 = shalt.err (!%p1275_p13)
}
  0x31   : > { %s1279_s25 = scalar_lea.vmem %s198_s15, 1024  ;;  %p1287_p5 = scmp.lt.s32.totalorder %s198_s15, %s198_s15 }
  0x32   : > { %p1280_p1 = scmp.ne.s32.totalorder %s198_s15, %s1279_s25  ;;  %p1288_p6 = scmp.lt.s32.totalorder %s1279_s25, %s1279_s25 }
  0x34   : > { %p1282_p2 = pnand %p1280_p1, %p1240_p0  ;;  %p1289_p9 = por %p1288_p6, %p1287_p5 }
  0x36   : > { %p1283_p4 = pneg %p1282_p2 }
  0x38   : > { %p1290_p11 = pnand %p1289_p9, %p1283_p4 }
  0x3a   : > { %1293 = shalt.err (!%p1290_p11)
}
  0x3b   : > { %1147 = dma.hbm_to_vmem [thread:$0]  (!%p1499_p10), %s1695_s1, 1024, %s198_s15, [#allocation9], %s1415_s10, %s1415_s10, %s1416_s11  }
  0x3c   : > { %s36_s12 = sadd.s32 1, %s1408_s19  ;;  %s92_s13 = sadd.s32 1, %s1400_s17 }
  0x3d   : > { %p38_p0 = scmp.ge.s32.totalorder %s36_s12, 2  ;;  %s211_s14 = sand.u32 1, %s1412_s20  }
  0x3e   : > { %s213_s26 = sand.u32 1, %s1400_s17   ;;  %s1028_s28 = sshll.u32 %s1408_s19, 10 }
  0x3f   : > { %s1720_s12 = smov (%p38_p0, %s36_s12), 0  ;;  %s990_s24 = sshll.u32 %s213_s26, 6 }
  0x40   : > { %s89_s29 = ssub.s32 %s1408_s19, %s1720_s12  ;;  %s1568_s6 = scalar_lea.hbm %s1696_s2, %s1028_s28 }
  0x41   : > { %p90_p3 = scmp.eq.s32.totalorder %s89_s29, 0  ;;  %s215_s15 = scalar_lea.vmem [#allocation10], %s990_s24 }
  0x42   : > { %s222_s7 = sshll.u32 %s215_s15, 4  ;;  %s1575_s8 = scalar_lea.sflag [#allocation6], %s211_s14  ;;  %s1573_s7 = int_to_ptr.vmem [resolvable:$true] %s222_s7 }
  0x43   : > { %s1571_s25 = scalar_select %p90_p3, %s1400_s17, %s92_s13  }
  0x44   : > { %s1294_s9 = scalar_lea.hbm %s1568_s6, 1024  ;;  %p1707_p7 = scmp.ne.s32.totalorder %s1706_s27, 0 }
  0x45   : > { %p1295_p10 = scmp.ne.s32.totalorder %s1568_s6, %s1294_s9  ;;  %s1299_s29 = scalar_lea.hbm %s1696_s2, 2048 }
  0x46   : > { %p1296_p8 = pneg %p1707_p7  ;;  %p1300_p1 = scmp.lt.u32.totalorder %s1568_s6, %s1696_s2 }
  0x47   : > { %p1301_p2 = scmp.lt.u32.totalorder %s1299_s29, %s1294_s9  ;;  %p1303_p5 = scmp.lt.u32.totalorder %s1294_s9, %s1568_s6 }
  0x48   : > { %p1297_p12 = pnand %p1296_p8, %p1295_p10 }
  0x49   : > { %p1302_p4 = por %p1301_p2, %p1300_p1 }
  0x4a   : > { %p1298_p13 = pneg %p1297_p12 }
  0x4b   : > { %p1304_p6 = por %p1303_p5, %p1302_p4 }
  0x4d   : > { %p1305_p9 = pnand %p1304_p6, %p1298_p13 }
  0x4f   : > { %1308 = shalt.err (!%p1305_p9)
}
  0x50   : > { %s1309_s13 = scalar_lea.vmem %s1573_s7, 1024  ;;  %s1418_s14 = smov [#allocation10]  }
  0x51   : > { %p1310_p11 = scmp.ne.s32.totalorder %s1573_s7, %s1309_s13  ;;  %s1314_s5 = sshll.u32 %s1418_s14, 4  ;;  %s1315_s5 = int_to_ptr.vmem [resolvable:$false] %s1314_s5 }
  0x52   : > { %s1316_s15 = scalar_lea.vmem %s1315_s5, 2048  ;;  %p1317_p10 = scmp.lt.s32.totalorder %s1573_s7, %s1315_s5 }
  0x53   : > { %p1312_p0 = pnand %p1310_p11, %p1296_p8  ;;  %p1318_p12 = scmp.lt.s32.totalorder %s1316_s15, %s1309_s13 }
  0x55   : > { %p1313_p3 = pneg %p1312_p0  ;;  %p1319_p1 = por %p1318_p12, %p1317_p10 }
  0x57   : > { %p1320_p2 = pnand %p1319_p1, %p1313_p3 }
  0x59   : > { %1323 = shalt.err (!%p1320_p2)
}
  0x5a   : > { %1151 = dma.hbm_to_vmem [thread:$0]  (!%p1707_p7), %s1568_s6, 1024, %s1573_s7, %s1575_s8, %s1415_s10, %s1415_s10, %s1416_s11  }
  0x5b   : > { %p1708_p8 = scmp.ne.s32.totalorder %s1704_s23, 0 }
  0x5c   : > { %p1709_p13 = scmp.eq.s32.totalorder (!%p1708_p8), %s1476_s21, 0 }
  0x5d   : > { %240 = sbr.rel (%p1708_p8) target bundleno = 659 (0x293), region = 36 }
  0x64   : > { %1375 = dma.done.wait (%p1709_p13), [#allocation6], 1024   ;;  %p1710_p4 = pmov %p1709_p13 }
  0x66   : > { %1377 = vsyncadd (%p1710_p4), [#allocation6], 4294966272  ;;  %p1711_p5 = pmov %p1710_p4 }
  0x67   : > { %p1712_p6 = pmov %p1710_p4 }
  0x68   : > { %1379 = dma.done.wait (%p1711_p5), [#allocation9], 1024  }
  0x69   : > { %1381 = vsyncadd (%p1712_p6), [#allocation9], 4294966272  ;;  %s250_s27 = sand.u32 1, %s1476_s21   ;;  %s252_s10 = sand.u32 1, %s1396_s16  }
  0x6a   : > { %s996_s11 = sshll.u32 %s252_s10, 6  ;;  %s251_s23 = scalar_lea.sflag [#allocation6], %s250_s27 }
  0x6b   : > { %s1618_s6 = scalar_lea.vmem [#allocation10], %s996_s11  ;;  %p1713_p7 = scmp.ne.s32.totalorder %s1703_s22, 0 }
  0x6d   : > { %1383 = dma.done.wait (%p1713_p7), %s251_s23, 1024  }
  0x6e   : > { %1385 = vsyncadd (%p1713_p7), %s251_s23, 4294966272  ;;  %p278_p9 = scmp.lt.s32.totalorder %s1404_s18, 1  ;;  %p283_p11 = scmp.eq.s32.totalorder %s1404_s18, 0 }
  0x6f   : > { %v1214_v0 = vld [vmem:[#allocation8] sm:$0xff] (%p283_p11)   ;;  %v1215_v1 = vld [vmem:[#allocation8 + $0x8] sm:$0xff] (%p283_p11)   ;;  %v1216_v2 = vld [vmem:[#allocation8 + $0x10] sm:$0xff] (%p283_p11)  }
  0x70   : > { %s1722_s18 = smov (!%p278_p9, %s1404_s18), 1  ;;  %291 = sbr.rel (!%p283_p11) target bundleno = 119 (0x77), region = 52 }
  0x71   : > { %s280_s9 = scalar_lea.vmem %s1697_s3, %s1722_s18  ;;  %356 = vst [vmem:[#allocation2] sm:$0xff] (%p283_p11), %v1214_v0  ;;  %357 = vst [vmem:[#allocation2 + $0x8] sm:$0xff] (%p283_p11), %v1215_v1  ;;  %v1217_v3 = vld [vmem:[#allocation8 + $0x18] sm:$0xff] (%p283_p11)   ;;  %v1218_v4 = vld [vmem:[#allocation8 + $0x20] sm:$0xff] (%p283_p11)  }
  0x72   : > { %358 = vst [vmem:[#allocation2 + $0x10] sm:$0xff] (%p283_p11), %v1216_v2  ;;  %359 = vst [vmem:[#allocation2 + $0x18] sm:$0xff] (%p283_p11), %v1217_v3  ;;  %v1219_v5 = vld [vmem:[#allocation8 + $0x28] sm:$0xff] (%p283_p11)   ;;  %v1220_v6 = vld [vmem:[#allocation8 + $0x30] sm:$0xff] (%p283_p11)  }
  0x73   : > { %360 = vst [vmem:[#allocation2 + $0x20] sm:$0xff] (%p283_p11), %v1218_v4  ;;  %361 = vst [vmem:[#allocation2 + $0x28] sm:$0xff] (%p283_p11), %v1219_v5  ;;  %v1221_v7 = vld [vmem:[#allocation8 + $0x38] sm:$0xff] (%p283_p11)  }
  0x74   : > { %362 = vst [vmem:[#allocation2 + $0x30] sm:$0xff] (%p283_p11), %v1220_v6  ;;  %363 = vst [vmem:[#allocation2 + $0x38] sm:$0xff] (%p283_p11), %v1221_v7 }
  0x77 PF: > { %v1222_v8 = vld [vmem:[%s1618_s6] sm:$0xff]   ;;  %v1223_v9 = vld [vmem:[%s1618_s6 + $0x8] sm:$0xff]   ;;  %v1224_v10 = vld [vmem:[%s1618_s6 + $0x10] sm:$0xff]   ;;  %s1419_s18 = smov [#allocation11]   ;;  %p1157_p0 = scmp.eq.s32.totalorder %s1476_s21, 1 }
  0x78   : > { %1063 = vmatprep.subr.bf16.mxu0 %v1222_v8  ;;  %v1225_v11 = vld [vmem:[%s1618_s6 + $0x18] sm:$0xff]   ;;  %v368_v12 = vld [vmem:[#allocation2] sm:$0xff]  ;;  %v1227_v14 = vld [vmem:[%s1618_s6 + $0x28] sm:$0xff]   ;;  %s882_s28 = sshll.u32 %s1419_s18, 4  ;;  %s1647_s28 = int_to_ptr.vmem [resolvable:$true] %s882_s28 }
  0x79   : > { %1064 = vmatpush3.bf16.msra.mxu0 %v1222_v8  ;;  %1079 = vmatprep.mubr.bf16.mxu0 %v368_v12  ;;  %v1226_v13 = vld [vmem:[%s1618_s6 + $0x20] sm:$0xff]   ;;  %v1228_v15 = vld [vmem:[%s1618_s6 + $0x30] sm:$0xff]   ;;  %v1229_v16 = vld [vmem:[%s1618_s6 + $0x38] sm:$0xff]   ;;  %s1324_s29 = scalar_lea.vmem %s1647_s28, 2048  ;;  %p1331_p1 = scmp.lt.s32.totalorder %s1647_s28, %s1647_s28 }
  0x7a   : > { %1065 = vmatprep.subr.bf16.mxu0 %v1223_v9  ;;  %v369_v17 = vld [vmem:[#allocation2 + $0x8] sm:$0xff]  ;;  %v370_v18 = vld [vmem:[#allocation2 + $0x10] sm:$0xff]  ;;  %v371_v19 = vld [vmem:[#allocation2 + $0x18] sm:$0xff]  ;;  %p1325_p3 = scmp.ne.s32.totalorder %s1647_s28, %s1324_s29  ;;  %p1332_p2 = scmp.lt.s32.totalorder %s1324_s29, %s1324_s29 }
  0x7b   : > { %v372_v20 = vld [vmem:[#allocation2 + $0x20] sm:$0xff]  ;;  %v373_v21 = vld [vmem:[#allocation2 + $0x28] sm:$0xff]  ;;  %v374_v22 = vld [vmem:[#allocation2 + $0x30] sm:$0xff] }
  0x7c   : > { %v375_v23 = vld [vmem:[#allocation2 + $0x38] sm:$0xff]  ;;  %v1230_v24 = vld [vmem:[#allocation5] sm:$0xff]   ;;  %v1231_v49 = vld [vmem:[#allocation5 + $0x8] sm:$0xff]   ;;  %p1326_p10 = pnand %p1325_p3, %p1157_p0  ;;  %p1333_p8 = por %p1332_p2, %p1331_p1 }
  0x7d   : > { %1066 = vmatpush3.bf16.msra.mxu0 %v1223_v9  ;;  %1111 = vmatprep.mubr.bf16.mxu1 %v1230_v24  ;;  %v1232_v50 = vld [vmem:[#allocation5 + $0x10] sm:$0xff]   ;;  %v1233_v51 = vld [vmem:[#allocation5 + $0x18] sm:$0xff]   ;;  %v1234_v52 = vld [vmem:[#allocation5 + $0x20] sm:$0xff]  }
  0x7e   : > { %1067 = vmatprep.subr.bf16.mxu0 %v1224_v10  ;;  %v1235_v53 = vld [vmem:[#allocation5 + $0x28] sm:$0xff]   ;;  %v1236_v54 = vld [vmem:[#allocation5 + $0x30] sm:$0xff]   ;;  %v1237_v55 = vld [vmem:[#allocation5 + $0x38] sm:$0xff]   ;;  %p1327_p12 = pneg %p1326_p10 }
  0x7f   : > { %v1023_v56 = vld [vmem:[%s280_s9] ss:$0 sm:$0xff] }
  0x80   : > { %p1334_p13 = pnand %p1333_p8, %p1327_p12 }
  0x81   : > { %1068 = vmatpush3.bf16.msra.mxu0 %v1224_v10 }
  0x82   : > { %1069 = vmatprep.subr.bf16.mxu0 %v1225_v11 }
  0x85   : > { %1070 = vmatpush3.bf16.msra.mxu0 %v1225_v11 }
  0x86   : > { %1071 = vmatprep.subr.bf16.mxu0 %v1226_v13 }
  0x89   : > { %1072 = vmatpush3.bf16.msra.mxu0 %v1226_v13 }
  0x8a   : > { %1073 = vmatprep.subr.bf16.mxu0 %v1227_v14 }
  0x8d   : > { %1074 = vmatpush3.bf16.msra.mxu0 %v1227_v14 }
  0x8e   : > { %1075 = vmatprep.subr.bf16.mxu0 %v1228_v15 }
  0x91   : > { %1076 = vmatpush3.bf16.msra.mxu0 %v1228_v15 }
  0x92   : > { %1077 = vmatprep.subr.bf16.mxu0 %v1229_v16 }
  0x95   : > { %1078 = vmatpush3.bf16.msra.mxu0 %v1229_v16 }
  0x98   : > { %1080 = vmatmul.mubr.bf16.vlgmr.msra.gmra.mrb[0].mxu0 %v369_v17 }
  0x99   : > { %1083 = vmatprep.mubr.bf16.mxu0 %v370_v18 }
  0xa0   : > { %1084 = vmatmul.mubr.bf16.gmra.mrb[4].mxu0 %v371_v19 }
  0xa1   : > { %1087 = vmatprep.mubr.bf16.mxu0 %v372_v20 }
  0xa8   : > { %1088 = vmatmul.mubr.bf16.gmra.mrb[8].mxu0 %v373_v21 }
  0xa9   : > { %1091 = vmatprep.mubr.bf16.mxu0 %v374_v22 }
  0xb0   : > { %1092 = vmatmul.mubr.bf16.gmra.mrb[12].mxu0 %v375_v23 }
 0x16b   : > { %v1081_v25 = vpop.f32.mrb[0].mxu0 }
 0x16c   : > { %v474_v26 = vpop.f32.mrb[1].mxu0 }
 0x16d   : > { %v1082_v27 = vpop.f32.mrb[2].mxu0 }
 0x16e   : > { %v538_v28 = vpack.c.bf16 %v1082_v27, %v1081_v25  ;;  %v477_v29 = vpop.f32.mrb[3].mxu0 }
 0x16f   : > { %v537_v30 = vpack.c.bf16 %v477_v29, %v474_v26 }
 0x171   : > { %1095 = vmatprep.subr.bf16.mxu1 %v537_v30 }
 0x172   : > { %1096 = vmatpush3.bf16.msra.mxu1 %v537_v30 }
 0x173   : > { %v1085_v31 = vpop.f32.mrb[4].mxu0  ;;  %1097 = vmatprep.subr.bf16.mxu1 %v538_v28 }
 0x174   : > { %v490_v32 = vpop.f32.mrb[5].mxu0 }
 0x175   : > { %v1086_v33 = vpop.f32.mrb[6].mxu0 }
 0x176   : > { %v540_v34 = vpack.c.bf16 %v1086_v33, %v1085_v31  ;;  %v493_v35 = vpop.f32.mrb[7].mxu0  ;;  %1098 = vmatpush3.bf16.msra.mxu1 %v538_v28 }
 0x177   : > { %v539_v36 = vpack.c.bf16 %v493_v35, %v490_v32 }
 0x179   : > { %1099 = vmatprep.subr.bf16.mxu1 %v539_v36 }
 0x17a   : > { %1100 = vmatpush3.bf16.msra.mxu1 %v539_v36 }
 0x17b   : > { %v1089_v37 = vpop.f32.mrb[8].mxu0  ;;  %1101 = vmatprep.subr.bf16.mxu1 %v540_v34 }
 0x17c   : > { %v506_v38 = vpop.f32.mrb[9].mxu0 }
 0x17d   : > { %v1090_v39 = vpop.f32.mrb[10].mxu0 }
 0x17e   : > { %v542_v40 = vpack.c.bf16 %v1090_v39, %v1089_v37  ;;  %v509_v41 = vpop.f32.mrb[11].mxu0  ;;  %1102 = vmatpush3.bf16.msra.mxu1 %v540_v34 }
 0x17f   : > { %v541_v42 = vpack.c.bf16 %v509_v41, %v506_v38 }
 0x181   : > { %1103 = vmatprep.subr.bf16.mxu1 %v541_v42 }
 0x182   : > { %1104 = vmatpush3.bf16.msra.mxu1 %v541_v42 }
 0x183   : > { %v1093_v43 = vpop.f32.mrb[12].mxu0  ;;  %1105 = vmatprep.subr.bf16.mxu1 %v542_v40 }
 0x184   : > { %v522_v44 = vpop.f32.mrb[13].mxu0 }
 0x185   : > { %v1094_v45 = vpop.f32.mrb[14].mxu0 }
 0x186   : > { %v544_v46 = vpack.c.bf16 %v1094_v45, %v1093_v43  ;;  %v525_v47 = vpop.f32.mrb[15].mxu0  ;;  %1106 = vmatpush3.bf16.msra.mxu1 %v542_v40 }
 0x187   : > { %v543_v48 = vpack.c.bf16 %v525_v47, %v522_v44 }
 0x189   : > { %1107 = vmatprep.subr.bf16.mxu1 %v543_v48 }
 0x18a   : > { %1108 = vmatpush3.bf16.msra.mxu1 %v543_v48 }
 0x18b   : > { %1109 = vmatprep.subr.bf16.mxu1 %v544_v46 }
 0x18e   : > { %1110 = vmatpush3.bf16.msra.mxu1 %v544_v46 }
 0x191   : > { %1112 = vmatmul.mubr.bf16.vlgmr.msra.gmra.mrb[0].mxu1 %v1231_v49 }
 0x192   : > { %1115 = vmatprep.mubr.bf16.mxu1 %v1232_v50 }
 0x199   : > { %1116 = vmatmul.mubr.bf16.gmra.mrb[4].mxu1 %v1233_v51 }
 0x19a   : > { %1119 = vmatprep.mubr.bf16.mxu1 %v1234_v52 }
 0x1a1   : > { %1120 = vmatmul.mubr.bf16.gmra.mrb[8].mxu1 %v1235_v53 }
 0x1a2   : > { %1123 = vmatprep.mubr.bf16.mxu1 %v1236_v54 }
 0x1a9   : > { %1124 = vmatmul.mubr.bf16.gmra.mrb[12].mxu1 %v1237_v55 }
 0x264   : > { %v1113_v57 = vpop.f32.mrb[0].mxu1 }
 0x265   : > { %v822_v58 = vadd.f32 %v1113_v57, %v1023_v56  ;;  %v699_v59 = vpop.f32.mrb[1].mxu1 }
 0x266   : > { %v820_v60 = vadd.f32 %v1023_v56, %v699_v59  ;;  %v1114_v61 = vpop.f32.mrb[2].mxu1 }
 0x267   : > { %838 = vst [vmem:[#allocation11 + $0x10] sm:$0xff] %v822_v58  ;;  %v823_v62 = vadd.f32 %v1114_v61, %v1023_v56  ;;  %v702_v63 = vpop.f32.mrb[3].mxu1 }
 0x268   : > { %836 = vst [vmem:[#allocation11] sm:$0xff] %v820_v60  ;;  %v821_v0 = vadd.f32 %v1023_v56, %v702_v63 }
 0x269   : > { %839 = vst [vmem:[#allocation11 + $0x18] sm:$0xff] %v823_v62  ;;  %v854_v1 = vpack.c.bf16 %v823_v62, %v822_v58 }
 0x26a   : > { %837 = vst [vmem:[#allocation11 + $0x8] sm:$0xff] %v821_v0  ;;  %v853_v2 = vpack.c.bf16 %v821_v0, %v820_v60 }
 0x26b   : > { %866 = vst [vmem:[#allocation2 + $0x8] sm:$0xff] %v854_v1 }
 0x26c   : > { %865 = vst [vmem:[#allocation2] sm:$0xff] %v853_v2  ;;  %v1117_v3 = vpop.f32.mrb[4].mxu1 }
 0x26d   : > { %v826_v4 = vadd.f32 %v1117_v3, %v1023_v56  ;;  %v715_v5 = vpop.f32.mrb[5].mxu1 }
 0x26e   : > { %v824_v6 = vadd.f32 %v1023_v56, %v715_v5  ;;  %v1118_v7 = vpop.f32.mrb[6].mxu1 }
 0x26f   : > { %842 = vst [vmem:[#allocation11 + $0x30] sm:$0xff] %v826_v4  ;;  %v827_v8 = vadd.f32 %v1118_v7, %v1023_v56  ;;  %v718_v9 = vpop.f32.mrb[7].mxu1 }
 0x270   : > { %840 = vst [vmem:[#allocation11 + $0x20] sm:$0xff] %v824_v6  ;;  %v825_v10 = vadd.f32 %v1023_v56, %v718_v9 }
 0x271   : > { %843 = vst [vmem:[#allocation11 + $0x38] sm:$0xff] %v827_v8  ;;  %v856_v11 = vpack.c.bf16 %v827_v8, %v826_v4 }
 0x272   : > { %841 = vst [vmem:[#allocation11 + $0x28] sm:$0xff] %v825_v10  ;;  %v855_v12 = vpack.c.bf16 %v825_v10, %v824_v6 }
 0x273   : > { %868 = vst [vmem:[#allocation2 + $0x18] sm:$0xff] %v856_v11 }
 0x274   : > { %867 = vst [vmem:[#allocation2 + $0x10] sm:$0xff] %v855_v12  ;;  %v1121_v13 = vpop.f32.mrb[8].mxu1 }
 0x275   : > { %v830_v14 = vadd.f32 %v1121_v13, %v1023_v56  ;;  %v731_v15 = vpop.f32.mrb[9].mxu1 }
 0x276   : > { %v828_v16 = vadd.f32 %v1023_v56, %v731_v15  ;;  %v1122_v17 = vpop.f32.mrb[10].mxu1 }
 0x277   : > { %846 = vst [vmem:[#allocation11 + $0x50] sm:$0xff] %v830_v14  ;;  %v831_v18 = vadd.f32 %v1122_v17, %v1023_v56  ;;  %v734_v19 = vpop.f32.mrb[11].mxu1 }
 0x278   : > { %844 = vst [vmem:[#allocation11 + $0x40] sm:$0xff] %v828_v16  ;;  %v829_v20 = vadd.f32 %v1023_v56, %v734_v19 }
 0x279   : > { %847 = vst [vmem:[#allocation11 + $0x58] sm:$0xff] %v831_v18  ;;  %v858_v21 = vpack.c.bf16 %v831_v18, %v830_v14 }
 0x27a   : > { %845 = vst [vmem:[#allocation11 + $0x48] sm:$0xff] %v829_v20  ;;  %v857_v22 = vpack.c.bf16 %v829_v20, %v828_v16 }
 0x27b   : > { %870 = vst [vmem:[#allocation2 + $0x28] sm:$0xff] %v858_v21 }
 0x27c   : > { %869 = vst [vmem:[#allocation2 + $0x20] sm:$0xff] %v857_v22  ;;  %v1125_v23 = vpop.f32.mrb[12].mxu1 }
 0x27d   : > { %v834_v24 = vadd.f32 %v1125_v23, %v1023_v56  ;;  %v747_v25 = vpop.f32.mrb[13].mxu1 }
 0x27e   : > { %v832_v26 = vadd.f32 %v1023_v56, %v747_v25  ;;  %v1126_v27 = vpop.f32.mrb[14].mxu1 }
 0x27f   : > { %850 = vst [vmem:[#allocation11 + $0x70] sm:$0xff] %v834_v24  ;;  %v835_v28 = vadd.f32 %v1126_v27, %v1023_v56  ;;  %v750_v29 = vpop.f32.mrb[15].mxu1 }
 0x280   : > { %848 = vst [vmem:[#allocation11 + $0x60] sm:$0xff] %v832_v26  ;;  %v833_v30 = vadd.f32 %v1023_v56, %v750_v29 }
 0x281   : > { %851 = vst [vmem:[#allocation11 + $0x78] sm:$0xff] %v835_v28  ;;  %v860_v31 = vpack.c.bf16 %v835_v28, %v834_v24 }
 0x282   : > { %849 = vst [vmem:[#allocation11 + $0x68] sm:$0xff] %v833_v30  ;;  %v859_v32 = vpack.c.bf16 %v833_v30, %v832_v26 }
 0x283   : > { %872 = vst [vmem:[#allocation2 + $0x38] sm:$0xff] %v860_v31 }
 0x284   : > { %1337 = shalt.err (!%p1334_p13)
}
 0x285   : > { %s1338_s13 = scalar_lea.hbm %s1698_s4, 2048 }
 0x286   : > { %p1339_p4 = scmp.ne.s32.totalorder %s1698_s4, %s1338_s13  ;;  %p1344_p7 = scmp.lt.u32.totalorder %s1338_s13, %s1698_s4 }
 0x288   : > { %p1340_p5 = pnand %p1339_p4, %p1157_p0 }
 0x28a   : > { %p1341_p6 = pneg %p1340_p5 }
 0x28c   : > { %p1346_p9 = pnand %p1344_p7, %p1341_p6 }
 0x28e   : > { %1349 = shalt.err (!%p1346_p9)
}
 0x28f   : > { %s1420_s10 = smov 128   ;;  %s1421_s11 = smov 8   ;;  %871 = vst [vmem:[#allocation2 + $0x30] sm:$0xff] %v859_v32 }
 0x290   : > { %1138 = dma.vmem_to_hbm [thread:$0]  (%p1157_p0), %s1647_s28, 2048, %s1698_s4, [#allocation7], %s1420_s10, %s1420_s10, %s1421_s11  }
 0x291   : > { %1387 = dma.done.wait (%p1157_p0), [#allocation7], 2048  }
 0x292   : > { %1389 = vsyncadd (%p1157_p0), [#allocation7], 4294965248 }
 0x293 PF: > { %s17_s20 = sadd.s32 1, %s1412_s20   ;;  %s1714_s15 = smov %s1396_s16 }
 0x294   : > { %p14_p11 = scmp.ge.s32.totalorder %s17_s20, 4   ;;  %s1715_s16 = smov %s1400_s17 }
 0x295   : > { %s1716_s17 = smov %s1571_s25  ;;  %s1717_s18 = smov %s1408_s19 }
 0x296   : > { %s1718_s19 = smov %s1720_s12  ;;  %16 = sbr.rel (!%p14_p11) target bundleno = 5 (0x5), region = 103 }
 0x29d   :  { %898 = vsyncpa [#allocation6], 1 }
 0x29e   :  { %900 = vsyncpa [#allocation6 + $0x1], 1 }
 0x29f   :  { %901 = vsyncpa [#allocation9], 1 }
 0x2a0   :  { %902 = vsyncpa [#allocation7], 1 }
 0x2a1   :  { %904 = vsyncpa [#allocation7 + $0x1], 1 }

</bundles_post_ra>
